<compile_context>
chip_gen: v6e
topology: v6e:2x2x1
jax: 0.10.0
libtpu: 0.0.40
codegen_flags: <defaults>
</compile_context>

<pallas_src>
import functools

import jax
import jax.numpy as jnp
from jax.experimental import pallas as pl
from jax.experimental.pallas import tpu as pltpu

# LocalResponseNorm(4, alpha=0.001/9, beta=0.75, k=1) constants
LRN_SIZE = 4
LRN_ALPHA = 0.001 / 9.0
LRN_K = 1.0

LANES = 128          # lane-dense channel padding for all kernel activations
N_CLASSES = 62

# conv2 geometry (fixed by the module: 14x14 -> pooled 7x7)
HO2, WO2 = 7, 8      # pooled output rows / cols per image (col 7 = alignment pad)
HH2, WH2 = 9, 10     # phase-split, halo-padded conv1-output half-rows / half-cols

# Tile maxima (sized for <= ~8-15 MiB per block incl. double buffering -> safe under
# the 32 MiB scoped VMEM limit on every generation; v5e/v6e could go 2-4x larger).
CONV1_TM_MAX = 2048  # pooled pixels per grid step for the conv1 block
CONV2_NB_MAX = 16    # images per grid step for the conv2 block
FC_TM_MAX = 256      # batch rows per grid step for the fc head

_COMPILER_PARAMS = pltpu.CompilerParams(
    dimension_semantics=("parallel",),          # independent M/batch tiles
    vmem_limit_bytes=32 * 1024 * 1024,
)


def _round_up(x, m):
    return ((x + m - 1) // m) * m


def _pick_tiles(m, t_max, mult):
    """Even tiling of m rows into `grid` blocks of `t` rows (t * grid >= m).

    Prefers >= 2 blocks when there is enough work so the "parallel" grid axis can
    feed both TensorCores on dual-TC chips (v7x); single-TC chips only pay one extra
    ~0.35us grid step for this."""
    grid = max(-(-m // t_max), 1)
    if grid == 1 and m >= 2 * mult:
        grid = 2
    t = _round_up(-(-m // grid), mult)
    return t, t * grid, grid


# ----------------------------------------------------------------------------
# Roll-direction probe (one-time): makes the LRN window exact under either
# rotate convention of pltpu.roll.
# ----------------------------------------------------------------------------
@functools.cache
def _roll_sign():
    """+1 if pltpu.roll follows the jnp.roll convention (out[c] = x[c - shift])."""
    def kernel(x_ref, o_ref):
        o_ref[...] = pltpu.roll(x_ref[...], 1, axis=1)

    x = jnp.broadcast_to(jnp.arange(LANES, dtype=jnp.float32), (8, LANES))
    y = pl.pallas_call(
        kernel, out_shape=jax.ShapeDtypeStruct((8, LANES), jnp.float32))(x)
    return 1 if int(y[0, 0]) == LANES - 1 else -1


def _shift_ch(x, d, sign):
    """Return y with y[..., c] = x[..., c - d] (lane rotate; last dim = 128)."""
    return pltpu.roll(x, (sign * d) % LANES, axis=x.ndim - 1)


def _lrn(x, sign):
    """PyTorch LRN(4, alpha, 0.75, 1) over lanes.  Requires channels >= 32 of x to
    be exactly zero so the rotate wrap-around contributes nothing."""
    sq = x * x
    ws = sq + _shift_ch(sq, 1, sign) + _shift_ch(sq, 2, sign) + _shift_ch(sq, -1, sign)
    base = LRN_K + (LRN_ALPHA / LRN_SIZE) * ws          # >= k = 1
    inv = jax.lax.rsqrt(base)                           # base^-1/2 (EUP)
    return x * (inv * jnp.sqrt(inv))                    # x * base^-3/4


# ----------------------------------------------------------------------------
# conv1 block: Conv(1->32,5x5,SAME) + bias + ReLU + MaxPool2x2 + LRN (one kernel)
# ----------------------------------------------------------------------------
def _conv1_kernel(p_ref, w_ref, b_ref, o_ref, *, roll_sign):
    tm = p_ref.shape[1]
    # (4, tm, 25) -> (4*tm, 25) is a pure leading-dim merge (tm multiple of 16).
    p = p_ref[...].reshape(4 * tm, p_ref.shape[2])
    y = jnp.dot(p, w_ref[...], preferred_element_type=jnp.float32) + b_ref[...]
    y = jnp.maximum(y, 0.0)                              # conv + bias + ReLU
    # 2x2 max-pool == max over the 4 pool-tap row groups (tile-aligned row slices).
    z = jnp.maximum(jnp.maximum(y[:tm], y[tm:2 * tm]),
                    jnp.maximum(y[2 * tm:3 * tm], y[3 * tm:]))
    o_ref[...] = _lrn(z, roll_sign).astype(o_ref.dtype)  # LRN after pool


def _conv1_patches(x_nhw):
    """x_nhw: (N, 28, 28) f32 -> (4, N*14*14, 25) bf16 im2col grouped by pool tap.

    Cin=1 makes this the only MXU-friendly formulation; its HBM footprint is small
    (~40 KB/image in bf16), unlike the old conv2 im2col."""
    n, h, w = x_nhw.shape
    ho, wo = h // 2, w // 2
    xp = jnp.pad(x_nhw, ((0, 0), (2, 2), (2, 2)))
    taps = []
    for th in range(2):
        for tw in range(2):
            feats = []
            for kh in range(5):
                for kw in range(5):
                    hs, ws = th + kh, tw + kw
                    feats.append(xp[:, hs:hs + 2 * ho - 1:2, ws:ws + 2 * wo - 1:2])
            taps.append(jnp.stack(feats, axis=-1))       # (N, Ho, Wo, 25)
    pat = jnp.stack(taps, axis=0).reshape(4, n * ho * wo, 25)
    return pat.astype(jnp.bfloat16)


def conv1_block(x_nhw, w_mat, b_row, *, roll_sign):
    """x_nhw: (N, 28, 28) f32 -> (N, 14, 14, 128) bf16, channels [32:] exactly 0."""
    n, h, w = x_nhw.shape
    ho, wo = h // 2, w // 2
    m = n * ho * wo
    patches = _conv1_patches(x_nhw)
    tm, m_pad, grid = _pick_tiles(m, CONV1_TM_MAX, 16)
    if m_pad != m:
        patches = jnp.pad(patches, ((0, 0), (0, m_pad - m), (0, 0)))

    out = pl.pallas_call(
        functools.partial(_conv1_kernel, roll_sign=roll_sign),
        out_shape=jax.ShapeDtypeStruct((m_pad, LANES), jnp.bfloat16),
        grid=(grid,),
        in_specs=[
            pl.BlockSpec((4, tm, 25), lambda i: (0, i, 0)),
            pl.BlockSpec((25, LANES), lambda i: (0, 0)),
            pl.BlockSpec((1, LANES), lambda i: (0, 0)),
        ],
        out_specs=pl.BlockSpec((tm, LANES), lambda i: (i, 0)),
        compiler_params=_COMPILER_PARAMS,
    )(patches, w_mat, b_row)
    return out[:m].reshape(n, ho, wo, LANES)


# ----------------------------------------------------------------------------
# conv2 block: Conv(32->32,5x5,SAME) + bias + ReLU + LRN + MaxPool2x2, with the
# conv built fully in-kernel (no HBM im2col).
# ----------------------------------------------------------------------------
def _conv2_kernel(x_ref, w_ref, b_ref, o_ref, *, roll_sign):
    # x_ref: (nb, 2, 9, 2, 10, 128) bf16  phase-split halo-padded conv1 output
    # w_ref: (25, 128, 128) bf16          one (Cin,Cout) matrix per (kh, kw)
    # b_ref: (1, 128) f32 ; o_ref: (nb, 7, 8, 128) bf16
    nb = x_ref.shape[0]
    rows = nb * HO2 * WO2
    b = b_ref[...]
    zmax = None
    for th in range(2):
        for tw in range(2):
            acc = jnp.zeros((rows, LANES), jnp.float32)
            for kh in range(5):
                ph, u0 = (th + kh) % 2, (th + kh) // 2
                for kw in range(5):
                    pw, v0 = (tw + kw) % 2, (tw + kw) // 2
                    # static unit-stride window: phases are ints, H slice is a
                    # leading dim, W slice is an 8-sublane window.
                    xs = x_ref[:, ph, u0:u0 + HO2, pw, v0:v0 + WO2, :]
                    acc = acc + jnp.dot(xs.reshape(rows, LANES),
                                        w_ref[kh * 5 + kw],
                                        preferred_element_type=jnp.float32)
            # module order: ReLU -> LRN -> MaxPool (max over taps below)
            z = _lrn(jnp.maximum(acc + b, 0.0), roll_sign)
            zmax = z if zmax is None else jnp.maximum(zmax, z)
    o_ref[...] = zmax.reshape(nb, HO2, WO2, LANES).astype(o_ref.dtype)


def conv2_block(h_nhwc, w_stk, b_row, *, roll_sign):
    """h_nhwc: (N, 14, 14, 128) bf16 -> (N, 7, 8, 128) bf16 (col 7 is padding)."""
    n = h_nhwc.shape[0]
    # Halo pad (2 top/bottom, 2 left, 4 right) then split H and W into
    # (phase, half-index) so every in-kernel tap/kh/kw access is unit-stride.
    hp = jnp.pad(h_nhwc, ((0, 0), (2, 2), (2, 4), (0, 0)))          # (N, 18, 20, 128)
    hs = hp.reshape(n, HH2, 2, WH2, 2, LANES).transpose(0, 2, 1, 4, 3, 5)
    # hs[n, h%2, h//2, w%2, w//2, c]  -- shape (N, 2, 9, 2, 10, 128)

    nb, n_pad, grid = _pick_tiles(n, CONV2_NB_MAX, 1)
    if n_pad != n:
        hs = jnp.pad(hs, ((0, n_pad - n),) + ((0, 0),) * 5)

    out = pl.pallas_call(
        functools.partial(_conv2_kernel, roll_sign=roll_sign),
        out_shape=jax.ShapeDtypeStruct((n_pad, HO2, WO2, LANES), jnp.bfloat16),
        grid=(grid,),
        in_specs=[
            pl.BlockSpec((nb, 2, HH2, 2, WH2, LANES), lambda i: (i, 0, 0, 0, 0, 0)),
            pl.BlockSpec((25, LANES, LANES), lambda i: (0, 0, 0)),
            pl.BlockSpec((1, LANES), lambda i: (0, 0)),
        ],
        out_specs=pl.BlockSpec((nb, HO2, WO2, LANES), lambda i: (i, 0, 0, 0)),
        compiler_params=_COMPILER_PARAMS,
    )(hs, w_stk, b_row)
    return out[:n]


# ----------------------------------------------------------------------------
# Fused fc1 + clamp(min=0) + fc2 kernel (lane-dense 128-channel input, no slice)
# ----------------------------------------------------------------------------
def _fc_kernel(x_ref, w1_ref, b1_ref, w2_ref, b2_ref, o_ref):
    h = jnp.dot(x_ref[...], w1_ref[...], preferred_element_type=jnp.float32)
    h = jnp.maximum(h + b1_ref[...], 0.0)                 # fc1 + clamp(min=0)
    y = jnp.dot(h.astype(w2_ref.dtype), w2_ref[...],
                preferred_element_type=jnp.float32) + b2_ref[...]
    o_ref[...] = y.astype(o_ref.dtype)


def fc_head(fc_in, w1_mat, b1_row, w2_mat, b2_row):
    """fc_in: (N, 7*8*128) bf16 lane-dense flatten of the conv2 output."""
    n, k1 = fc_in.shape
    h1 = w1_mat.shape[1]
    tm, m_pad, grid = _pick_tiles(n, FC_TM_MAX, 16)
    x = jnp.pad(fc_in, ((0, m_pad - n), (0, 0))) if m_pad != n else fc_in

    out = pl.pallas_call(
        _fc_kernel,
        out_shape=jax.ShapeDtypeStruct((m_pad, LANES), jnp.float32),
        grid=(grid,),
        in_specs=[
            pl.BlockSpec((tm, k1), lambda i: (i, 0)),
            pl.BlockSpec((k1, h1), lambda i: (0, 0)),
            pl.BlockSpec((1, h1), lambda i: (0, 0)),
            pl.BlockSpec((h1, LANES), lambda i: (0, 0)),
            pl.BlockSpec((1, LANES), lambda i: (0, 0)),
        ],
        out_specs=pl.BlockSpec((tm, LANES), lambda i: (i, 0)),
        compiler_params=_COMPILER_PARAMS,
    )(x, w1_mat, b1_row, w2_mat, b2_row)
    return out[:n, :N_CLASSES]


# ----------------------------------------------------------------------------
# One-time parameter preparation (hoisted out of the jitted forward)
# ----------------------------------------------------------------------------
def prepare_params(params):
    cout = params["w1"].shape[0]                              # 32
    # conv1: (kh,kw,cin=1)-major rows, out channels zero-padded to 128 lanes.
    w1 = params["w1"].transpose(2, 3, 1, 0).reshape(25, cout)
    w1 = jnp.pad(w1, ((0, 0), (0, LANES - cout))).astype(jnp.bfloat16)
    b1 = jnp.pad(params["b1"], (0, LANES - cout)).reshape(1, LANES).astype(jnp.float32)
    # conv2: one (Cin,Cout) matrix per (kh,kw), both channel dims zero-padded to 128.
    c2in = params["w2"].shape[1]                              # 32
    w2 = params["w2"].transpose(2, 3, 1, 0)                   # (5,5,Cin,Cout)
    w2 = jnp.pad(w2, ((0, 0), (0, 0), (0, LANES - c2in), (0, LANES - cout)))
    w2 = w2.reshape(25, LANES, LANES).astype(jnp.bfloat16)
    b2 = jnp.pad(params["b2"], (0, LANES - cout)).reshape(1, LANES).astype(jnp.float32)
    # fc1: accept the lane-dense (N, 7, 8, 128) conv2 output directly.  PyTorch
    # column c*49 + h*7 + w maps to our row h*1024 + w*128 + c; rows for the padding
    # column (w == 7) or padded channels (c >= 32) are zero.
    h1 = params["fc1_w"].shape[0]                             # 256
    f1 = params["fc1_w"].reshape(h1, cout, 7, 7).transpose(2, 3, 1, 0)   # (7,7,32,256)
    f1 = jnp.pad(f1, ((0, 0), (0, WO2 - 7), (0, LANES - cout), (0, 0)))
    f1 = f1.reshape(7 * WO2 * LANES, h1).astype(jnp.bfloat16)
    fb1 = params["fc1_b"].reshape(1, h1).astype(jnp.float32)
    # fc2: out features zero-padded to 128 lanes.
    n_out = params["fc2_w"].shape[0]                          # 62
    f2 = jnp.pad(params["fc2_w"].T, ((0, 0), (0, LANES - n_out))).astype(jnp.bfloat16)
    fb2 = jnp.pad(params["fc2_b"], (0, LANES - n_out)).reshape(1, LANES)
    fb2 = fb2.astype(jnp.float32)
    return dict(conv1_w=w1, conv1_b=b1, conv2_w=w2, conv2_b=b2,
                fc1_w=f1, fc1_b=fb1, fc2_w=f2, fc2_b=fb2)


# ----------------------------------------------------------------------------
# Full CNNEMnist forward
# ----------------------------------------------------------------------------
def cnn_emnist_forward(x, prep, *, roll_sign):
    """x: (N, 1, 28, 28) f32 NCHW -> logits (N, 62) f32."""
    n = x.shape[0]
    # conv1 block: Conv(1->32,5,pad2)+ReLU+MaxPool2+LRN (one fused kernel)
    h = conv1_block(x[:, 0, :, :], prep["conv1_w"], prep["conv1_b"],
                    roll_sign=roll_sign)                      # (N, 14, 14, 128) bf16
    # conv2 block: Conv(32->32,5,pad2)+ReLU+LRN+MaxPool2 (conv built in-kernel)
    h = conv2_block(h, prep["conv2_w"], prep["conv2_b"],
                    roll_sign=roll_sign)                      # (N, 7, 8, 128) bf16
    # fc head: fc1 + clamp(min=0) + fc2, lane-dense flatten (no channel slice)
    fc_in = h.reshape(n, 7 * WO2 * LANES)
    return fc_head(fc_in, prep["fc1_w"], prep["fc1_b"], prep["fc2_w"], prep["fc2_b"])


# ----------------------------------------------------------------------------
# Pure-JAX reference for the sanity check
# ----------------------------------------------------------------------------
def _ref_lrn(x):
    sq = x * x
    c = x.shape[1]
    sqp = jnp.pad(sq, ((0, 0), (2, 1), (0, 0), (0, 0)))
    ws = sum(sqp[:, t:t + c] for t in range(LRN_SIZE))
    return x / (LRN_K + (LRN_ALPHA / LRN_SIZE) * ws) ** 0.75


def _ref_pool(x):
    n, c, h, w = x.shape
    return x.reshape(n, c, h // 2, 2, w // 2, 2).max(axis=(3, 5))


def ref_forward(x, p):
    def conv(x, w, b):
        y = jax.lax.conv_general_dilated(
            x, w, (1, 1), "SAME",
            dimension_numbers=("NCHW", "OIHW", "NCHW"),
            precision=jax.lax.Precision.HIGHEST)
        return y + b[None, :, None, None]

    h = jnp.maximum(conv(x, p["w1"], p["b1"]), 0.0)
    h = _ref_lrn(_ref_pool(h))
    h = jnp.maximum(conv(h, p["w2"], p["b2"]), 0.0)
    h = _ref_pool(_ref_lrn(h))
    h = h.reshape(h.shape[0], -1)
    h = jnp.maximum(h @ p["fc1_w"].T + p["fc1_b"], 0.0)
    return h @ p["fc2_w"].T + p["fc2_b"]


# ----------------------------------------------------------------------------
if __name__ == "__main__":
    key = jax.random.PRNGKey(0)
    kx, k1, k2, k3, k4, k5, k6, k7, k8 = jax.random.split(key, 9)

    # Deterministic synthetic parameters (shapes from the module __init__).
    params = {
        "w1": jax.random.normal(k1, (32, 1, 5, 5), jnp.float32) * 0.1,
        "b1": jax.random.normal(k2, (32,), jnp.float32) * 0.1,
        "w2": jax.random.normal(k3, (32, 32, 5, 5), jnp.float32) * 0.05,
        "b2": jax.random.normal(k4, (32,), jnp.float32) * 0.1,
        "fc1_w": jax.random.normal(k5, (256, 7 * 7 * 32), jnp.float32) * 0.02,
        "fc1_b": jax.random.normal(k6, (256,), jnp.float32) * 0.1,
        "fc2_w": jax.random.normal(k7, (62, 256), jnp.float32) * 0.05,
        "fc2_b": jax.random.normal(k8, (62,), jnp.float32) * 0.1,
    }

    # Small batch; spatial must be 28x28 (fc1 expects 7*7*32 after two 2x pools).
    x = jax.random.normal(kx, (2, 1, 28, 28), jnp.float32)

    prep = prepare_params(params)              # one-time weight relayout/pad/cast
    roll_sign = _roll_sign()                   # one-time roll-direction probe
    fwd = jax.jit(functools.partial(cnn_emnist_forward, roll_sign=roll_sign))

    out = jax.block_until_ready(fwd(x, prep))

    assert out.shape == (2, 62), out.shape
    assert bool(jnp.all(jnp.isfinite(out)))

    ref = ref_forward(x, params)
    assert bool(jnp.allclose(out, ref, rtol=5e-2, atol=5e-2)), (
        float(jnp.max(jnp.abs(out - ref))))

    print("KERNEL_OK")
</pallas_src>

<mosaic_0001>
module attributes {stable_mosaic.version = 11 : i64} {
  func.func @kernel(%arg0: memref<8x128xf32, #tpu.memory_space<vmem>>, %arg1: memref<8x128xf32, #tpu.memory_space<vmem>>) attributes {dimension_semantics = [], scalar_prefetch = 0 : i64, scratch_operands = 0 : i64, tpu.core_type = #tpu.core_type<tc>} {
    %c0 = arith.constant 0 : index
    %c0_0 = arith.constant 0 : index
    %0 = vector.load %arg0[%c0, %c0_0] : memref<8x128xf32, #tpu.memory_space<vmem>>, vector<8x128xf32>
    %c1_i32 = arith.constant 1 : i32
    %1 = tpu.dynamic_rotate %0 by %c1_i32 dim 1 : vector<8x128xf32>, i32 -> vector<8x128xf32>
    %c0_1 = arith.constant 0 : index
    %c0_2 = arith.constant 0 : index
    %2 = vector.load %arg1[%c0_1, %c0_2] : memref<8x128xf32, #tpu.memory_space<vmem>>, vector<8x128xf32>
    tpu.vector_store %arg1[%c0_1, %c0_2], %1 {strides = array<i32>} : memref<8x128xf32, #tpu.memory_space<vmem>>, vector<8x128xf32>,
    return
  }
}

</mosaic_0001>

<bundles_post_ra>
// kernel: tpu_custom_call.1
= control target key start
LH: loop header
LB: loop body
LE: loop exit
PB: predicated region body
PF: predicated region fallthrough
CT: control target
= control target key end

     0   :  { %6 = vsyncpa [#allocation3], 0  ;;  %s106_s0 = inlined_call_operand.hbm [shape: f32[8,128], index: 0, kind: input, shape index: {}]   ;;  %s107_s1 = inlined_call_operand.hbm [shape: f32[8,128], index: 1, kind: output, shape index: {}]  }
   0x1   :  { %7 = vsyncpa [#allocation4], 0  ;;  %s87_s6 = smov [#allocation2]  }
   0x2   :  { %s14_s7 = sshll.u32 %s87_s6, 4  ;;  %s15_s7 = int_to_ptr.vmem [resolvable:$true] %s14_s7 }
   0x3   :  { %s51_s8 = scalar_lea.vmem %s15_s7, 128  ;;  %p56_p1 = scmp.lt.s32.totalorder %s15_s7, %s15_s7 }
   0x4   :  { %p52_p0 = scmp.ne.s32.totalorder %s15_s7, %s51_s8  ;;  %p57_p2 = scmp.lt.s32.totalorder %s51_s8, %s51_s8 }
   0x6   :  { %p58_p3 = por %p57_p2, %p56_p1 }
   0x8   :  { %p59_p4 = pnand %p58_p3, %p52_p0 }
   0xa   :  { %62 = shalt.err (!%p59_p4)
}
   0xb   :  { %17 = dma.hbm_to_vmem [thread:$0]  %s106_s0, 128, %s15_s7, [#allocation3]  }
   0xc   :  { %83 = dma.done.wait [#allocation3], 128  }
   0xd   :  { %84 = vsyncadd [#allocation3], 4294967168  ;;  %v21_v0 = vld [vmem:[#allocation2] sm:$0xff]  ;;  %s88_s11 = smov 1   ;;  %s89_s12 = smov [#allocation5]  }
   0xe   :  { %22 = vrot.lane.b32.xlu0 %v21_v0, %s88_s11  ;;  %s31_s13 = sshll.u32 %s89_s12, 4  ;;  %s32_s13 = int_to_ptr.vmem [resolvable:$true] %s31_s13 }
   0xf   :  { %s63_s14 = scalar_lea.vmem %s32_s13, 128  ;;  %p68_p6 = scmp.lt.s32.totalorder %s32_s13, %s32_s13 }
  0x10   :  { %p64_p5 = scmp.ne.s32.totalorder %s32_s13, %s63_s14  ;;  %p69_p7 = scmp.lt.s32.totalorder %s63_s14, %s63_s14 }
  0x12   :  { %p70_p8 = por %p69_p7, %p68_p6 }
  0x14   :  { %p71_p9 = pnand %p70_p8, %p64_p5 }
  0x80   :  { %v23_v1 = vpop.permute.xlu0 %22 }
  0x81   :  { %24 = vst [vmem:[#allocation5] sm:$0xff] %v23_v1 }
  0x82   :  { %74 = shalt.err (!%p71_p9)
}
  0x83   :  { %34 = dma.vmem_to_hbm [thread:$0]  %s32_s13, 128, %s107_s1, [#allocation4]  }
  0x84   :  { %85 = dma.done.wait [#allocation4], 128  }
  0x85   :  { %86 = vsyncadd [#allocation4], 4294967168 }
  0x86   :  { %38 = vsyncpa [#allocation3], 1 }
  0x87   :  { %39 = vsyncpa [#allocation4], 1 }

</bundles_post_ra>
